<compile_context>
chip_gen: v7x
topology: tpu7x:2x2x1
jax: 0.10.0
libtpu: 0.0.40
codegen_flags: <defaults>
</compile_context>

<pallas_src>
import math

import jax
import jax.numpy as jnp
import numpy as np
from jax.experimental import pallas as pl
from jax.experimental.pallas import tpu as pltpu


# ----------------------------------------------------------------------------
# Fused kernel: all layers, flat activations, batch folded into matmul rows.
# ----------------------------------------------------------------------------
def _make_fused_kernel(layer_cfgs):
    """layer_cfgs: tuple of (residual_rate, is_final) per layer."""

    def kernel(x_ref, *refs):
        # x_ref  : (bt, in_pn0*in_ch0)   flat input activations for this batch tile
        # refs   : T_0, R_0, b_0, T_1, R_1, b_1, ..., out_ref
        #   T_l  : (in_pn*in_ch, out_pn*out_ch)  fused gather+vcoeff+weight operator
        #   R_l  : (in_pn*in_ch, out_pn*out_ch)  fused residual operator
        #   b_l  : (1, out_pn*out_ch)            flattened per-point bias
        # out_ref: (bt, out_pn_L*out_ch_L)       lane-dense (=128) output
        out_ref = refs[-1]
        h = x_ref[...]
        for l, (rr, is_final) in enumerate(layer_cfgs):
            t_ref, r_ref, b_ref = refs[3 * l], refs[3 * l + 1], refs[3 * l + 2]
            z = jnp.dot(h, t_ref[...], preferred_element_type=jnp.float32)
            z = z + b_ref[...]
            if not is_final:
                # ELU(alpha=1); clamp the discarded branch so exp() never overflows.
                z = jnp.where(z > 0.0, z, jnp.exp(jnp.minimum(z, 0.0)) - 1.0)
            if rr > 0:
                a_main = float(math.sqrt(1.0 - rr))
                a_res = float(math.sqrt(rr))
                res = jnp.dot(h, r_ref[...], preferred_element_type=jnp.float32)
                z = z * a_main + res * a_res
            h = z
        out_ref[...] = h.astype(out_ref.dtype)

    return kernel


# ----------------------------------------------------------------------------
# Batch-invariant parameter folding (wrapper glue, runs once per jit trace).
# ----------------------------------------------------------------------------
def _prepare_layer_operators(layer):
    in_ch, out_ch = layer["in_ch"], layer["out_ch"]
    in_pn, out_pn = layer["in_pn"], layer["out_pn"]
    M = layer["weight_num"]
    ids = layer["neighbor_ids"]                      # (out_pn, max_nb), pad id == in_pn
    rr = layer["residual_rate"]

    mask = (ids != in_pn).astype(jnp.float32)        # (out_pn, max_nb)
    # One-hot scatter of neighbor ids (pad id falls outside arange -> all-zero row).
    onehot = (ids[..., None] == jnp.arange(in_pn)[None, None, :]).astype(jnp.float32)
    onehot = onehot * mask[..., None]                # (out_pn, max_nb, in_pn)

    # A[m,p,q] = sum_n vcoeffs[p,n,m] * mask[p,n] * [ids[p,n]==q]
    A = jnp.einsum("pnm,pnq->mpq", layer["vcoeffs"], onehot)       # (M, out_pn, in_pn)
    Wn = layer["weights"].reshape(M, out_ch, in_ch)                # (M, out_ch, in_ch)
    # T[(q,i),(p,o)] = sum_m A[m,p,q] * Wn[m,o,i]
    T = jnp.einsum("mpq,moi->qipo", A, Wn).reshape(in_pn * in_ch, out_pn * out_ch)
    bias_flat = layer["bias"].reshape(1, out_pn * out_ch)

    if rr > 0:
        if out_pn != in_pn:
            p = jnp.abs(layer["p_neighbors"]) * mask
            p = p / (jnp.sum(p, axis=1, keepdims=True) + 1e-8)     # (out_pn, max_nb)
            Rp = jnp.einsum("pn,pnq->pq", p, onehot)               # (out_pn, in_pn)
        else:
            Rp = jnp.eye(in_pn, dtype=jnp.float32)
        if out_ch != in_ch:
            wres = layer["weight_res"].reshape(out_ch, in_ch)
        else:
            wres = jnp.eye(in_ch, dtype=jnp.float32)
        # R[(q,i),(p,o)] = Rp[p,q] * wres[o,i]
        R = jnp.einsum("pq,oi->qipo", Rp, wres).reshape(in_pn * in_ch, out_pn * out_ch)
    else:
        R = jnp.zeros((in_pn * in_ch, out_pn * out_ch), jnp.float32)

    return T, R, bias_flat


def _batch_tile(batch):
    for t in (256, 128, 64, 32, 16, 8):
        if batch % t == 0:
            return t
    return batch


# ----------------------------------------------------------------------------
# Forward wrapper: one pallas_call for the whole MeshConvDisc forward.
# ----------------------------------------------------------------------------
def mesh_conv_disc_forward(x, layers):
    """MeshConvDisc.forward == MCFixedEnc over all layers (last layer is final)."""
    B = x.shape[0]
    in_pn0, in_ch0 = layers[0]["in_pn"], layers[0]["in_ch"]
    out_pn_L, out_ch_L = layers[-1]["out_pn"], layers[-1]["out_ch"]
    d_in0 = in_pn0 * in_ch0
    d_out = out_pn_L * out_ch_L

    layer_cfgs = tuple(
        (float(layer["residual_rate"]), i == len(layers) - 1)
        for i, layer in enumerate(layers))
    kernel = _make_fused_kernel(layer_cfgs)

    bt = _batch_tile(B)
    grid = (B // bt,)

    x_flat = x.reshape(B, d_in0)
    in_arrays = [x_flat]
    in_specs = [pl.BlockSpec((bt, d_in0), lambda b: (b, 0))]
    for layer in layers:
        T, R, bflat = _prepare_layer_operators(layer)
        for arr in (T, R, bflat):
            in_arrays.append(arr)
            # batch-invariant parameters: full block, same tile every grid step
            in_specs.append(pl.BlockSpec(arr.shape, lambda b: (0, 0)))

    out_flat = pl.pallas_call(
        kernel,
        out_shape=jax.ShapeDtypeStruct((B, d_out), jnp.float32),
        grid=grid,
        in_specs=in_specs,
        out_specs=pl.BlockSpec((bt, d_out), lambda b: (b, 0)),
        compiler_params=pltpu.CompilerParams(
            dimension_semantics=("parallel",)),   # shards batch tiles across v7x's 2 TCs
    )(*in_arrays)

    return out_flat.reshape(B, out_pn_L, out_ch_L)


# ----------------------------------------------------------------------------
# Pure-JAX reference (mirrors the PyTorch LASMConvssw.forward exactly).
# ----------------------------------------------------------------------------
def lasm_conv_layer_ref(in_pc, layer, is_final):
    B = in_pc.shape[0]
    in_ch, out_ch = layer["in_ch"], layer["out_ch"]
    in_pn, out_pn = layer["in_pn"], layer["out_pn"]
    M = layer["weight_num"]
    ids = layer["neighbor_ids"]
    rr = layer["residual_rate"]

    pc_mask = jnp.ones((in_pn + 1,), jnp.float32).at[in_pn].set(0.0)
    mask = pc_mask[ids]                                             # (out_pn, max_nb)
    ww = layer["vcoeffs"] * mask[:, :, None]
    x_pad = jnp.concatenate(
        [in_pc, jnp.zeros((B, 1, in_ch), jnp.float32)], axis=1)
    x_nb = jnp.take(x_pad, ids, axis=1)                             # (B, out_pn, max_nb, in_ch)
    fuse = jnp.einsum('pnm,bpni->bpmi', ww, x_nb)
    Wn = layer["weights"].reshape(M, out_ch, in_ch)
    out_nb = jnp.einsum('moi,bpmi->bpmo', Wn, fuse)
    out = out_nb.sum(2) + layer["bias"]
    if not is_final:
        out = jnp.where(out > 0.0, out, jnp.exp(out) - 1.0)
    if rr > 0:
        if in_ch != out_ch:
            x_pad = jnp.einsum('oi,bpi->bpo',
                               layer["weight_res"].reshape(out_ch, in_ch), x_pad)
        if in_pn == out_pn:
            res = x_pad[:, :in_pn]
        else:
            nb2 = jnp.take(x_pad, ids, axis=1)
            p = jnp.abs(layer["p_neighbors"]) * mask
            p = p / (jnp.sum(p, axis=1, keepdims=True) + 1e-8)
            res = jnp.einsum('pn,bpno->bpo', p, nb2)
        out = out * np.sqrt(1.0 - rr) + res * np.sqrt(rr)
    return out


# ----------------------------------------------------------------------------
# Deterministic in-script construction of structure + parameters.
# ----------------------------------------------------------------------------
def build_mesh_conv_disc(key, enc_channel_list, ptnum_list, max_nb, weight_num,
                         residual_rate=0.9):
    layers = []
    num_layers = len(enc_channel_list) - 1
    for l in range(num_layers):
        in_ch, out_ch = enc_channel_list[l], enc_channel_list[l + 1]
        in_pn, out_pn = ptnum_list[l], ptnum_list[l + 1]
        key, k1, k2, k3, k4, k5, k6 = jax.random.split(key, 7)
        # synthetic connection info: per out-point neighbor count + padded id list
        nb_counts = jax.random.randint(k1, (out_pn,), 2, max_nb + 1)
        ids = jax.random.randint(k2, (out_pn, max_nb), 0, in_pn)
        ids = jnp.where(jnp.arange(max_nb)[None, :] < nb_counts[:, None],
                        ids, in_pn).astype(jnp.int32)
        avg_nb = max(1, int(round(float(jnp.mean(nb_counts.astype(jnp.float32))))))
        layer = dict(
            in_ch=in_ch, out_ch=out_ch, in_pn=in_pn, out_pn=out_pn,
            weight_num=weight_num, residual_rate=residual_rate,
            neighbor_ids=ids,
            weights=jax.random.normal(k3, (weight_num, out_ch * in_ch), jnp.float32),
            bias=jnp.zeros((out_pn, out_ch), jnp.float32),        # per-point bias
            vcoeffs=jax.random.normal(k4, (out_pn, max_nb, weight_num), jnp.float32)
            / (avg_nb * weight_num),
        )
        if out_pn != in_pn:
            layer["p_neighbors"] = (
                jax.random.normal(k5, (out_pn, max_nb), jnp.float32) / avg_nb)
        if out_ch != in_ch:
            layer["weight_res"] = (
                jax.random.normal(k6, (1, out_ch * in_ch), jnp.float32) / out_ch)
        layers.append(layer)
    return layers


if __name__ == "__main__":
    enc_channel_list = [4, 8, 16]      # channel_lst
    ptnum_list = [24, 16, 8]           # point_num per layer (downsampling encoder)
    max_neighbor_num = 6
    weight_num = 4
    batch = 2

    key = jax.random.PRNGKey(0)
    key, kparams, kx = jax.random.split(key, 3)
    layers = build_mesh_conv_disc(kparams, enc_channel_list, ptnum_list,
                                  max_neighbor_num, weight_num)
    x = jax.random.normal(kx, (batch, ptnum_list[0], enc_channel_list[0]),
                          jnp.float32)

    fwd = jax.jit(lambda xin: mesh_conv_disc_forward(xin, layers))
    out = jax.block_until_ready(fwd(x))

    # pure-JAX reference check
    ref = x
    for i, layer in enumerate(layers):
        ref = lasm_conv_layer_ref(ref, layer, is_final=(i == len(layers) - 1))
    ref = jax.block_until_ready(ref)

    assert out.shape == (batch, ptnum_list[-1], enc_channel_list[-1])
    np.testing.assert_allclose(np.asarray(out), np.asarray(ref),
                               rtol=1e-4, atol=1e-4)
    print("KERNEL_OK")
</pallas_src>

<mosaic_0001>
module attributes {stable_mosaic.version = 11 : i64} {
  func.func @kernel(%arg0: i32, %arg1: memref<2x96xf32, #tpu.memory_space<vmem>>, %arg2: memref<96x128xf32, #tpu.memory_space<vmem>>, %arg3: memref<96x128xf32, #tpu.memory_space<vmem>>, %arg4: memref<1x128xf32, #tpu.memory_space<vmem>>, %arg5: memref<128x128xf32, #tpu.memory_space<vmem>>, %arg6: memref<128x128xf32, #tpu.memory_space<vmem>>, %arg7: memref<1x128xf32, #tpu.memory_space<vmem>>, %arg8: memref<2x128xf32, #tpu.memory_space<vmem>>) attributes {dimension_semantics = [#tpu.dimension_semantics<parallel>], iteration_bounds = array<i64: 1>, scalar_prefetch = 0 : i64, scratch_operands = 0 : i64, tpu.core_type = #tpu.core_type<tc>, window_params = [{transform_indices = @transform_0, window_bounds = array<i64: 2, 96>}, {pipeline_mode = #tpu.pipeline_mode<synchronous>, transform_indices = @transform_1, window_bounds = array<i64: 96, 128>}, {pipeline_mode = #tpu.pipeline_mode<synchronous>, transform_indices = @transform_2, window_bounds = array<i64: 96, 128>}, {pipeline_mode = #tpu.pipeline_mode<synchronous>, transform_indices = @transform_3, window_bounds = array<i64: 1, 128>}, {pipeline_mode = #tpu.pipeline_mode<synchronous>, transform_indices = @transform_4, window_bounds = array<i64: 128, 128>}, {pipeline_mode = #tpu.pipeline_mode<synchronous>, transform_indices = @transform_5, window_bounds = array<i64: 128, 128>}, {pipeline_mode = #tpu.pipeline_mode<synchronous>, transform_indices = @transform_6, window_bounds = array<i64: 1, 128>}, {transform_indices = @transform_7, window_bounds = array<i64: 2, 128>}]} {
    %c0 = arith.constant 0 : index
    %c0_0 = arith.constant 0 : index
    %0 = vector.load %arg1[%c0, %c0_0] : memref<2x96xf32, #tpu.memory_space<vmem>>, vector<2x96xf32>
    %c0_1 = arith.constant 0 : index
    %c0_2 = arith.constant 0 : index
    %1 = vector.load %arg2[%c0_1, %c0_2] : memref<96x128xf32, #tpu.memory_space<vmem>>, vector<96x128xf32>
    %cst = arith.constant dense<0.000000e+00> : vector<2x128xf32>
    %2 = tpu.matmul %0, %1, %cst {dimension_numbers = #tpu.dot_dimension_numbers<[1], [0], [0], [1], [0, 0, 1, 1], [], []>} : vector<2x96xf32>, vector<96x128xf32>, vector<2x128xf32> -> vector<2x128xf32>
    %c0_3 = arith.constant 0 : index
    %c0_4 = arith.constant 0 : index
    %3 = vector.load %arg4[%c0_3, %c0_4] : memref<1x128xf32, #tpu.memory_space<vmem>>, vector<1x128xf32>
    %4 = vector.broadcast %3 : vector<1x128xf32> to vector<2x128xf32>
    %5 = arith.addf %2, %4 : vector<2x128xf32>
    %cst_5 = arith.constant 0.000000e+00 : f32
    %6 = vector.broadcast %cst_5 : f32 to vector<2x128xf32>
    %7 = arith.cmpf ogt, %5, %6 : vector<2x128xf32>
    %cst_6 = arith.constant 0.000000e+00 : f32
    %8 = vector.broadcast %cst_6 : f32 to vector<2x128xf32>
    %9 = arith.minimumf %5, %8 : vector<2x128xf32>
    %10 = math.exp %9 : vector<2x128xf32>
    %cst_7 = arith.constant 1.000000e+00 : f32
    %11 = vector.broadcast %cst_7 : f32 to vector<2x128xf32>
    %12 = arith.subf %10, %11 : vector<2x128xf32>
    %13 = arith.select %7, %5, %12 : vector<2x128xi1>, vector<2x128xf32>
    %c0_8 = arith.constant 0 : index
    %c0_9 = arith.constant 0 : index
    %14 = vector.load %arg3[%c0_8, %c0_9] : memref<96x128xf32, #tpu.memory_space<vmem>>, vector<96x128xf32>
    %cst_10 = arith.constant dense<0.000000e+00> : vector<2x128xf32>
    %15 = tpu.matmul %0, %14, %cst_10 {dimension_numbers = #tpu.dot_dimension_numbers<[1], [0], [0], [1], [0, 0, 1, 1], [], []>} : vector<2x96xf32>, vector<96x128xf32>, vector<2x128xf32> -> vector<2x128xf32>
    %cst_11 = arith.constant 0.316227764 : f32
    %16 = vector.broadcast %cst_11 : f32 to vector<2x128xf32>
    %17 = arith.mulf %13, %16 : vector<2x128xf32>
    %cst_12 = arith.constant 0.948683321 : f32
    %18 = vector.broadcast %cst_12 : f32 to vector<2x128xf32>
    %19 = arith.mulf %15, %18 : vector<2x128xf32>
    %20 = arith.addf %17, %19 : vector<2x128xf32>
    %c0_13 = arith.constant 0 : index
    %c0_14 = arith.constant 0 : index
    %21 = vector.load %arg5[%c0_13, %c0_14] : memref<128x128xf32, #tpu.memory_space<vmem>>, vector<128x128xf32>
    %cst_15 = arith.constant dense<0.000000e+00> : vector<2x128xf32>
    %22 = tpu.matmul %20, %21, %cst_15 {dimension_numbers = #tpu.dot_dimension_numbers<[1], [0], [0], [1], [0, 0, 1, 1], [], []>} : vector<2x128xf32>, vector<128x128xf32>, vector<2x128xf32> -> vector<2x128xf32>
    %c0_16 = arith.constant 0 : index
    %c0_17 = arith.constant 0 : index
    %23 = vector.load %arg7[%c0_16, %c0_17] : memref<1x128xf32, #tpu.memory_space<vmem>>, vector<1x128xf32>
    %24 = vector.broadcast %23 : vector<1x128xf32> to vector<2x128xf32>
    %25 = arith.addf %22, %24 : vector<2x128xf32>
    %c0_18 = arith.constant 0 : index
    %c0_19 = arith.constant 0 : index
    %26 = vector.load %arg6[%c0_18, %c0_19] : memref<128x128xf32, #tpu.memory_space<vmem>>, vector<128x128xf32>
    %cst_20 = arith.constant dense<0.000000e+00> : vector<2x128xf32>
    %27 = tpu.matmul %20, %26, %cst_20 {dimension_numbers = #tpu.dot_dimension_numbers<[1], [0], [0], [1], [0, 0, 1, 1], [], []>} : vector<2x128xf32>, vector<128x128xf32>, vector<2x128xf32> -> vector<2x128xf32>
    %cst_21 = arith.constant 0.316227764 : f32
    %28 = vector.broadcast %cst_21 : f32 to vector<2x128xf32>
    %29 = arith.mulf %25, %28 : vector<2x128xf32>
    %cst_22 = arith.constant 0.948683321 : f32
    %30 = vector.broadcast %cst_22 : f32 to vector<2x128xf32>
    %31 = arith.mulf %27, %30 : vector<2x128xf32>
    %32 = arith.addf %29, %31 : vector<2x128xf32>
    %c0_23 = arith.constant 0 : index
    %c0_24 = arith.constant 0 : index
    %33 = vector.load %arg8[%c0_23, %c0_24] : memref<2x128xf32, #tpu.memory_space<vmem>>, vector<2x128xf32>
    tpu.vector_store %arg8[%c0_23, %c0_24], %32 {strides = array<i32>} : memref<2x128xf32, #tpu.memory_space<vmem>>, vector<2x128xf32>,
    return
  }
  func.func @transform_0(%arg0: i32) -> (i32, i32) {
    %c0_i32 = arith.constant 0 : i32
    %c0_i32_0 = arith.constant 0 : i32
    return %arg0, %c0_i32 : i32, i32
  }
  func.func @transform_1(%arg0: i32) -> (i32, i32) {
    %c0_i32 = arith.constant 0 : i32
    %c0_i32_0 = arith.constant 0 : i32
    %c0_i32_1 = arith.constant 0 : i32
    return %c0_i32, %c0_i32_0 : i32, i32
  }
  func.func @transform_2(%arg0: i32) -> (i32, i32) {
    %c0_i32 = arith.constant 0 : i32
    %c0_i32_0 = arith.constant 0 : i32
    %c0_i32_1 = arith.constant 0 : i32
    return %c0_i32, %c0_i32_0 : i32, i32
  }
  func.func @transform_3(%arg0: i32) -> (i32, i32) {
    %c0_i32 = arith.constant 0 : i32
    %c0_i32_0 = arith.constant 0 : i32
    %c0_i32_1 = arith.constant 0 : i32
    return %c0_i32, %c0_i32_0 : i32, i32
  }
  func.func @transform_4(%arg0: i32) -> (i32, i32) {
    %c0_i32 = arith.constant 0 : i32
    %c0_i32_0 = arith.constant 0 : i32
    %c0_i32_1 = arith.constant 0 : i32
    return %c0_i32, %c0_i32_0 : i32, i32
  }
  func.func @transform_5(%arg0: i32) -> (i32, i32) {
    %c0_i32 = arith.constant 0 : i32
    %c0_i32_0 = arith.constant 0 : i32
    %c0_i32_1 = arith.constant 0 : i32
    return %c0_i32, %c0_i32_0 : i32, i32
  }
  func.func @transform_6(%arg0: i32) -> (i32, i32) {
    %c0_i32 = arith.constant 0 : i32
    %c0_i32_0 = arith.constant 0 : i32
    %c0_i32_1 = arith.constant 0 : i32
    return %c0_i32, %c0_i32_0 : i32, i32
  }
  func.func @transform_7(%arg0: i32) -> (i32, i32) {
    %c0_i32 = arith.constant 0 : i32
    %c0_i32_0 = arith.constant 0 : i32
    return %arg0, %c0_i32 : i32, i32
  }
}

</mosaic_0001>

<bundles_post_ra>
// kernel: _lambda_.1
= control target key start
LH: loop header
LB: loop body
LE: loop exit
PB: predicated region body
PF: predicated region fallthrough
CT: control target
= control target key end

     0   :  { %v676_v0 = vmov 0.0|0.0   ;;  %vm677_vm0 = vmmov 0   ;;  %v678_v6 = vmov 0.0   ;;  %vm46_vm1 = vcmask 785408   ;;  %s937_s1 = inlined_call_operand.vmem [shape: f32[96,128], index: 1, kind: input, shape index: {}]   ;;  %s938_s2 = inlined_call_operand.vmem [shape: f32[96,128], index: 2, kind: input, shape index: {}]   ;;  %s939_s4 = inlined_call_operand.vmem [shape: f32[128,128], index: 4, kind: input, shape index: {}]   ;;  %s940_s0 = inlined_call_operand.vmem [shape: f32[2,96], index: 0, kind: input, shape index: {}]   ;;  %s941_s5 = inlined_call_operand.vmem [shape: f32[128,128], index: 5, kind: input, shape index: {}]   ;;  %s942_s3 = inlined_call_operand.vmem [shape: f32[1,128], index: 3, kind: input, shape index: {}, may-alias: {3,6}]   ;;  %s943_s6 = inlined_call_operand.vmem [shape: f32[1,128], index: 6, kind: input, shape index: {}, may-alias: {3,6}]   ;;  %s944_s7 = inlined_call_operand.vmem [shape: f32[2,128], index: 7, kind: output, shape index: {}]  }
   0x1   :  { %587 = vmatprep.subr.bf16.mxu0 %v676_v0  ;;  %v27_v1 = vld [vmem:[%s937_s1] sm:$0xff]  ;;  %v28_v2 = vld [vmem:[%s937_s1 + $0x8] sm:$0xff]  ;;  %v29_v3 = vld [vmem:[%s937_s1 + $0x10] sm:$0xff]  ;;  %605 = vmatprep.subr.bf16.mxu1 %v676_v0 }
   0x2   :  { %v588_v4 = vpack.c.bf16 %v28_v2, %v27_v1  ;;  %v30_v5 = vld [vmem:[%s937_s1 + $0x18] sm:$0xff]  ;;  %487 = vmatprep.mubr.msk.f32.mxu0 %vm677_vm0, %v678_v6  ;;  %514 = vmatprep.mubr.msk.f32.mxu1 %vm677_vm0, %v678_v6  ;;  %v126_v8 = vld [vmem:[%s938_s2] sm:$0xff]  ;;  %v127_v9 = vld [vmem:[%s938_s2 + $0x8] sm:$0xff] }
   0x3   :  { %v591_v7 = vpack.c.bf16 %v30_v5, %v29_v3  ;;  %v31_v10 = vld [vmem:[%s937_s1 + $0x20] sm:$0xff]  ;;  %v32_v11 = vld [vmem:[%s937_s1 + $0x28] sm:$0xff]  ;;  %v606_v12 = vpack.c.bf16 %v127_v9, %v126_v8  ;;  %v128_v13 = vld [vmem:[%s938_s2 + $0x10] sm:$0xff] }
   0x4   :  { %589 = vmatpush3.bf16.msra.mxu0 %v588_v4  ;;  %v129_v14 = vld [vmem:[%s938_s2 + $0x18] sm:$0xff]  ;;  %v594_v16 = vpack.c.bf16 %v32_v11, %v31_v10  ;;  %v130_v17 = vld [vmem:[%s938_s2 + $0x20] sm:$0xff]  ;;  %v131_v18 = vld [vmem:[%s938_s2 + $0x28] sm:$0xff] }
   0x5   :  { %590 = vmatprep.subr.bf16.mxu0 %v676_v0  ;;  %607 = vmatpush3.bf16.msra.mxu1 %v606_v12  ;;  %v609_v15 = vpack.c.bf16 %v129_v14, %v128_v13  ;;  %v33_v19 = vld [vmem:[%s937_s1 + $0x30] sm:$0xff]  ;;  %v34_v20 = vld [vmem:[%s937_s1 + $0x38] sm:$0xff]  ;;  %v612_v21 = vpack.c.bf16 %v131_v18, %v130_v17  ;;  %v35_v25 = vld [vmem:[%s937_s1 + $0x40] sm:$0xff] }
   0x6   :  { %608 = vmatprep.subr.bf16.mxu1 %v676_v0  ;;  %v597_v22 = vpack.c.bf16 %v34_v20, %v33_v19  ;;  %v132_v23 = vld [vmem:[%s938_s2 + $0x30] sm:$0xff]  ;;  %v133_v24 = vld [vmem:[%s938_s2 + $0x38] sm:$0xff]  ;;  %v36_v26 = vld [vmem:[%s937_s1 + $0x48] sm:$0xff] }
   0x7   :  { %v615_v27 = vpack.c.bf16 %v133_v24, %v132_v23  ;;  %v600_v28 = vpack.c.bf16 %v36_v26, %v35_v25  ;;  %v134_v29 = vld [vmem:[%s938_s2 + $0x40] sm:$0xff]  ;;  %v135_v30 = vld [vmem:[%s938_s2 + $0x48] sm:$0xff]  ;;  %v37_v31 = vld [vmem:[%s937_s1 + $0x50] sm:$0xff] }
   0x8   :  { %592 = vmatpush3.bf16.msra.mxu0 %v591_v7  ;;  %v38_v32 = vld [vmem:[%s937_s1 + $0x58] sm:$0xff]  ;;  %v618_v33 = vpack.c.bf16 %v135_v30, %v134_v29  ;;  %v136_v35 = vld [vmem:[%s938_s2 + $0x50] sm:$0xff]  ;;  %v211_v37 = vld [vmem:[%s939_s4] sm:$0xff] }
   0x9   :  { %593 = vmatprep.subr.bf16.mxu0 %v676_v0  ;;  %610 = vmatpush3.bf16.msra.mxu1 %v609_v15  ;;  %v603_v34 = vpack.c.bf16 %v38_v32, %v37_v31  ;;  %v137_v36 = vld [vmem:[%s938_s2 + $0x58] sm:$0xff]  ;;  %v212_v38 = vld [vmem:[%s939_s4 + $0x8] sm:$0xff]  ;;  %v26_v40 = vld [vmem:[%s940_s0] sm:$0x3] }
   0xa   :  { %611 = vmatprep.subr.bf16.mxu1 %v676_v0  ;;  %v621_v39 = vpack.c.bf16 %v137_v36, %v136_v35  ;;  %v624_v41 = vpack.c.bf16 %v212_v38, %v211_v37  ;;  %v304_v42 = vld [vmem:[%s941_s5] sm:$0xff]  ;;  %v305_v43 = vld [vmem:[%s941_s5 + $0x8] sm:$0xff]  ;;  %v213_v44 = vld [vmem:[%s939_s4 + $0x10] sm:$0xff] }
   0xb   :  { %v214_v45 = vld [vmem:[%s939_s4 + $0x18] sm:$0xff]  ;;  %v648_v46 = vpack.c.bf16 %v305_v43, %v304_v42  ;;  %v306_v48 = vld [vmem:[%s941_s5 + $0x10] sm:$0xff]  ;;  %v215_v51 = vld [vmem:[%s939_s4 + $0x20] sm:$0xff] }
   0xc   :  { %595 = vmatpush3.bf16.msra.mxu0 %v594_v16  ;;  %v627_v47 = vpack.c.bf16 %v214_v45, %v213_v44  ;;  %v307_v49 = vld [vmem:[%s941_s5 + $0x18] sm:$0xff]  ;;  %v216_v52 = vld [vmem:[%s939_s4 + $0x28] sm:$0xff]  ;;  %v308_v53 = vld [vmem:[%s941_s5 + $0x20] sm:$0xff] }
   0xd   :  { %596 = vmatprep.subr.bf16.mxu0 %v676_v0  ;;  %613 = vmatpush3.bf16.msra.mxu1 %v612_v21  ;;  %v651_v50 = vpack.c.bf16 %v307_v49, %v306_v48  ;;  %v630_v54 = vpack.c.bf16 %v216_v52, %v215_v51  ;;  %v309_v55 = vld [vmem:[%s941_s5 + $0x28] sm:$0xff]  ;;  %v217_v57 = vld [vmem:[%s939_s4 + $0x30] sm:$0xff]  ;;  %v218_v58 = vld [vmem:[%s939_s4 + $0x38] sm:$0xff] }
   0xe   :  { %614 = vmatprep.subr.bf16.mxu1 %v676_v0  ;;  %v654_v56 = vpack.c.bf16 %v309_v55, %v308_v53  ;;  %v310_v59 = vld [vmem:[%s941_s5 + $0x30] sm:$0xff]  ;;  %v633_v60 = vpack.c.bf16 %v218_v58, %v217_v57  ;;  %v311_v61 = vld [vmem:[%s941_s5 + $0x38] sm:$0xff]  ;;  %v219_v63 = vld [vmem:[%s939_s4 + $0x40] sm:$0xff] }
   0xf   :  { %v657_v62 = vpack.c.bf16 %v311_v61, %v310_v59  ;;  %v220_v1 = vld [vmem:[%s939_s4 + $0x48] sm:$0xff]  ;;  %v312_v2 = vld [vmem:[%s941_s5 + $0x40] sm:$0xff]  ;;  %v222_v7 = vld [vmem:[%s939_s4 + $0x58] sm:$0xff] }
  0x10   :  { %598 = vmatpush3.bf16.msra.mxu0 %v597_v22  ;;  %v636_v3 = vpack.c.bf16 %v220_v1, %v219_v63  ;;  %v313_v4 = vld [vmem:[%s941_s5 + $0x48] sm:$0xff]  ;;  %v314_v8 = vld [vmem:[%s941_s5 + $0x50] sm:$0xff]  ;;  %v315_v10 = vld [vmem:[%s941_s5 + $0x58] sm:$0xff] }
  0x11   :  { %599 = vmatprep.subr.bf16.mxu0 %v676_v0  ;;  %616 = vmatpush3.bf16.msra.mxu1 %v615_v27  ;;  %v660_v5 = vpack.c.bf16 %v313_v4, %v312_v2  ;;  %v663_v11 = vpack.c.bf16 %v315_v10, %v314_v8  ;;  %v223_v12 = vld [vmem:[%s939_s4 + $0x60] sm:$0xff]  ;;  %v224_v13 = vld [vmem:[%s939_s4 + $0x68] sm:$0xff]  ;;  %v225_v18 = vld [vmem:[%s939_s4 + $0x70] sm:$0xff] }
  0x12   :  { %617 = vmatprep.subr.bf16.mxu1 %v676_v0  ;;  %v316_v14 = vld [vmem:[%s941_s5 + $0x60] sm:$0xff]  ;;  %v642_v15 = vpack.c.bf16 %v224_v13, %v223_v12  ;;  %v317_v16 = vld [vmem:[%s941_s5 + $0x68] sm:$0xff]  ;;  %v226_v19 = vld [vmem:[%s939_s4 + $0x78] sm:$0xff] }
  0x13   :  { %v666_v17 = vpack.c.bf16 %v317_v16, %v316_v14  ;;  %v318_v20 = vld [vmem:[%s941_s5 + $0x70] sm:$0xff]  ;;  %v645_v21 = vpack.c.bf16 %v226_v19, %v225_v18  ;;  %v319_v22 = vld [vmem:[%s941_s5 + $0x78] sm:$0xff]  ;;  %v398_v24 = vld [vmem:[%s942_s3] ss:$0 sm:$0xff] }
  0x14   :  { %601 = vmatpush3.bf16.msra.mxu0 %v600_v28  ;;  %v669_v23 = vpack.c.bf16 %v319_v22, %v318_v20  ;;  %v402_v37 = vld [vmem:[%s943_s6] ss:$0 sm:$0xff] }
  0x15   :  { %602 = vmatprep.subr.bf16.mxu0 %v676_v0  ;;  %619 = vmatpush3.bf16.msra.mxu1 %v618_v33 }
  0x16   :  { %620 = vmatprep.subr.bf16.mxu1 %v676_v0 }
  0x18   :  { %604 = vmatpush3.bf16.msra.mxu0 %v603_v34 }
  0x19   :  { %623 = vmatprep.subr.bf16.mxu0 %v676_v0  ;;  %622 = vmatpush3.bf16.msra.mxu1 %v621_v39 }
  0x1a   :  { %647 = vmatprep.subr.bf16.mxu1 %v676_v0 }
  0x1b   :  { %488 = vmatmul.mubr.msk.f32.vlgmr.msra.gmra.mrb[0].mxu0 %vm46_vm1, %v26_v40 }
  0x1c   :  { %625 = vmatpush3.bf16.msra.mxu0 %v624_v41  ;;  %549 = vmatprep.mubr.msk.f32.mxu0 %vm677_vm0, %v678_v6 }
  0x1d   :  { %626 = vmatprep.subr.bf16.mxu0 %v676_v0  ;;  %515 = vmatmul.mubr.msk.f32.vlgmr.msra.gmra.mrb[0].mxu1 %vm46_vm1, %v26_v40 }
  0x1e   :  { %649 = vmatpush3.bf16.msra.mxu1 %v648_v46  ;;  %584 = vmatprep.mubr.msk.f32.mxu1 %vm677_vm0, %v678_v6  ;;  %v221_v6 = vld [vmem:[%s939_s4 + $0x50] sm:$0xff] }
  0x1f   :  { %650 = vmatprep.subr.bf16.mxu1 %v676_v0  ;;  %v639_v9 = vpack.c.bf16 %v222_v7, %v221_v6 }
  0x20   :  { %628 = vmatpush3.bf16.msra.mxu0 %v627_v47 }
  0x21   :  { %629 = vmatprep.subr.bf16.mxu0 %v676_v0 }
  0x22   :  { %652 = vmatpush3.bf16.msra.mxu1 %v651_v50 }
  0x23   :  { %653 = vmatprep.subr.bf16.mxu1 %v676_v0 }
  0x24   :  { %631 = vmatpush3.bf16.msra.mxu0 %v630_v54 }
  0x25   :  { %632 = vmatprep.subr.bf16.mxu0 %v676_v0 }
  0x26   :  { %655 = vmatpush3.bf16.msra.mxu1 %v654_v56 }
  0x27   :  { %656 = vmatprep.subr.bf16.mxu1 %v676_v0 }
  0x28   :  { %634 = vmatpush3.bf16.msra.mxu0 %v633_v60 }
  0x29   :  { %635 = vmatprep.subr.bf16.mxu0 %v676_v0 }
  0x2a   :  { %658 = vmatpush3.bf16.msra.mxu1 %v657_v62 }
  0x2b   :  { %659 = vmatprep.subr.bf16.mxu1 %v676_v0 }
  0x2c   :  { %637 = vmatpush3.bf16.msra.mxu0 %v636_v3 }
  0x2d   :  { %638 = vmatprep.subr.bf16.mxu0 %v676_v0 }
  0x2e   :  { %661 = vmatpush3.bf16.msra.mxu1 %v660_v5 }
  0x2f   :  { %662 = vmatprep.subr.bf16.mxu1 %v676_v0 }
  0x30   :  { %640 = vmatpush3.bf16.msra.mxu0 %v639_v9 }
  0x31   :  { %641 = vmatprep.subr.bf16.mxu0 %v676_v0 }
  0x32   :  { %664 = vmatpush3.bf16.msra.mxu1 %v663_v11 }
  0x33   :  { %665 = vmatprep.subr.bf16.mxu1 %v676_v0 }
  0x34   :  { %643 = vmatpush3.bf16.msra.mxu0 %v642_v15 }
  0x35   :  { %644 = vmatprep.subr.bf16.mxu0 %v676_v0 }
  0x36   :  { %667 = vmatpush3.bf16.msra.mxu1 %v666_v17 }
  0x37   :  { %668 = vmatprep.subr.bf16.mxu1 %v676_v0 }
  0x38   :  { %646 = vmatpush3.bf16.msra.mxu0 %v645_v21 }
  0x3a   :  { %670 = vmatpush3.bf16.msra.mxu1 %v669_v23 }
  0xee   :  { %v116_v25 = vpop.f32.mrb[0].mxu0 }
  0xef   :  { %v117_v26 = vadd.f32 %v398_v24, %v116_v25  ;;  %v489_v27 = vpop.f32.mrb[1].mxu0 }
  0xf0   :  { %v204_v29 = vpop.f32.mrb[0].mxu1 }
  0xf1   :  { %v121_v28 = vmin.f32 %v117_v26, 0.0  ;;  %v516_v30 = vpop.f32.mrb[1].mxu1  ;;  %vm120_vm2 = vcmp.gt.f32.partialorder %v117_v26, 0.0  ;;  %v209_v33 = vmul.f32 0.9486833, %v204_v29 }
  0xf3   :  { %v122_v31 = vmul.f32 1.442695, %v121_v28 }
  0xf5   :  { %674 = vpow2.f32 %v122_v31 }
  0xff   :  { %v675_v0 = vpop.eup %674 }
 0x100   :  { %v400_v32 = vadd.f32 -1.0, %v675_v0 }
 0x102   :  { %v125_v34 = vsel %vm120_vm2, %v117_v26, %v400_v32 }
 0x103   :  { %v208_v35 = vmul.f32 0.31622776, %v125_v34 }
 0x105   :  { %v210_v36 = vadd.f32 %v209_v33, %v208_v35 }
 0x107   :  { %550 = vmatmul.mubr.f32.vlgmr.msra.gmra.mrb[2].mxu0 %v210_v36  ;;  %585 = vmatmul.mubr.f32.vlgmr.msra.gmra.mrb[2].mxu1 %v210_v36 }
 0x1da   :  { %v300_v38 = vpop.f32.mrb[2].mxu0  ;;  %v386_v39 = vpop.f32.mrb[2].mxu1 }
 0x1db   :  { %v301_v40 = vadd.f32 %v402_v37, %v300_v38  ;;  %v551_v41 = vpop.f32.mrb[3].mxu0  ;;  %v586_v42 = vpop.f32.mrb[3].mxu1  ;;  %v391_v44 = vmul.f32 0.9486833, %v386_v39 }
 0x1dd   :  { %v390_v43 = vmul.f32 0.31622776, %v301_v40 }
 0x1df   :  { %v392_v45 = vadd.f32 %v391_v44, %v390_v43 }
 0x1e1   :  { %393 = vst [vmem:[%s944_s7] sm:$0x3] %v392_v45 }

</bundles_post_ra>
